<compile_context>
chip_gen: v6e
topology: v6e:2x2x1
jax: 0.10.0
libtpu: 0.0.40
codegen_flags: <defaults>
</compile_context>

<pallas_src>
import math

import jax
import jax.numpy as jnp
from jax.experimental import pallas as pl
from jax.experimental.pallas import tpu as pltpu

# ----------------------------------------------------------------------------
# Synthetic descriptor set (degrees 1, 2, 3 -- "correlation 3", like MACE).
#   Each path: (x1_segment_indices_tuple, x0_segment, out_segment, coefficient)
# ----------------------------------------------------------------------------
U = 32    # channel width per segment (the "u" of CUDAKernel)
S0 = 2    # x0 segments
S1 = 3    # x1 segments
S2 = 2    # output segments

PATHS = [
    # degree 1
    ((0,),        0, 0,  1.00),
    ((1,),        0, 1,  0.50),
    ((2,),        1, 0, -0.70),
    # degree 2
    ((0, 0),      0, 0,  0.30),
    ((0, 1),      1, 1,  1.20),
    ((1, 2),      0, 1, -0.40),
    ((2, 2),      1, 0,  0.80),
    # degree 3
    ((0, 1, 2),   0, 0,  0.25),
    ((1, 1, 1),   1, 1, -0.15),
    ((0, 0, 2),   1, 0,  0.60),
]

X0_SIZE = S0 * U
X1_SIZE = S1 * U
X2_SIZE = S2 * U


def _round_up(x, m):
    return -(-x // m) * m


# ----------------------------------------------------------------------------
# Pallas kernel: batch-last, lane-dense hot path.
#   x0t_ref: (X0_SIZE, num_x0)  transposed x0 table (tiny, resident in VMEM)
#   i0_ref : (1, TB)            int32 indices for this batch tile
#   x1_ref : (X1_SIZE, TB)
#   out_ref: (X2_SIZE, TB)
# ----------------------------------------------------------------------------
def stp_kernel(x0t_ref, i0_ref, x1_ref, out_ref):
    tb = x1_ref.shape[-1]
    num_x0 = x0t_ref.shape[-1]

    # In-kernel gather: one-hot(i0) matmul on the (otherwise idle) MXU.
    i0 = i0_ref[...]                                              # (1, tb) i32
    rows = jax.lax.broadcasted_iota(jnp.int32, (num_x0, tb), 0)   # (num_x0, tb)
    onehot = (rows == i0).astype(jnp.float32)                     # (num_x0, tb)
    x0g = jnp.dot(x0t_ref[...].astype(jnp.float32), onehot,
                  preferred_element_type=jnp.float32)             # (X0_SIZE, tb)

    # Single upcast per block (no per-path casts).
    x1 = x1_ref[...].astype(jnp.float32)                          # (X1_SIZE, tb)

    # Sublane-aligned segment views (U = 32 is a multiple of the 8-row tile).
    def x0seg(s):
        return x0g[s * U:(s + 1) * U, :]

    def x1seg(s):
        return x1[s * U:(s + 1) * U, :]

    # Memoized monomials in x1 (shared factors across paths computed once).
    mono_cache = {}

    def monomial(segs):
        key = tuple(sorted(segs))
        if key not in mono_cache:
            if len(key) == 1:
                mono_cache[key] = x1seg(key[0])
            else:
                mono_cache[key] = monomial(key[:-1]) * x1seg(key[-1])
        return mono_cache[key]

    # Static unroll over paths (baked in at "module init" time).
    accs = [None] * S2
    for x1_segs, s0, s_out, coeff in PATHS:
        term = (x0seg(s0) * jnp.float32(coeff)) * monomial(x1_segs)
        accs[s_out] = term if accs[s_out] is None else accs[s_out] + term

    out = jnp.concatenate(
        [a if a is not None else jnp.zeros((U, tb), jnp.float32) for a in accs],
        axis=0)                                                   # (X2_SIZE, tb)
    out_ref[...] = out.astype(out_ref.dtype)                      # one slab store


# ----------------------------------------------------------------------------
# Wrapper reproducing IWeightedSymmetricTensorProduct.forward glue.
# ----------------------------------------------------------------------------
def iwstp_forward(x0, i0, x1, *, tb=2048):
    assert x0.ndim == 2 and x0.shape[1] == X0_SIZE
    assert x1.shape[-1] == X1_SIZE
    num_x0 = x0.shape[0]

    shape = jnp.broadcast_shapes(i0.shape, x1.shape[:-1])
    B = math.prod(shape)

    # Broadcast only when needed so full-shape inputs stay views.
    i0b = i0 if tuple(i0.shape) == tuple(shape) else jnp.broadcast_to(i0, shape)
    x1b = (x1 if tuple(x1.shape[:-1]) == tuple(shape)
           else jnp.broadcast_to(x1, shape + (X1_SIZE,)))
    i0f = i0b.reshape(B).astype(jnp.int32)
    x1f = x1b.reshape(B, X1_SIZE)

    # Batch tile: multiple of 128 (lane axis), capped by the batch itself.
    tb_eff = min(_round_up(tb, 128), _round_up(B, 128))
    Bp = _round_up(B, tb_eff)

    # Lane-dense batch-last layout (layout plumbing; pad fuses into the copy).
    x1_t = x1f.T                           # (X1_SIZE, B)
    i0_t = i0f.reshape(1, B)               # (1, B)
    if Bp != B:
        # Pad index with 0 (valid row); padded x1 columns are zero, so every
        # path's product is zero there -- padded outputs are sliced off below.
        x1_t = jnp.pad(x1_t, ((0, 0), (0, Bp - B)))
        i0_t = jnp.pad(i0_t, ((0, 0), (0, Bp - B)))
    x0_t = x0.T                            # (X0_SIZE, num_x0), tiny

    out_t = pl.pallas_call(
        stp_kernel,
        out_shape=jax.ShapeDtypeStruct((X2_SIZE, Bp), x1.dtype),
        grid_spec=pltpu.PrefetchScalarGridSpec(
            num_scalar_prefetch=0,
            grid=(Bp // tb_eff,),
            in_specs=[
                # x0 table: constant block index -> stays resident in VMEM.
                pl.BlockSpec((X0_SIZE, num_x0), lambda b: (0, 0)),
                pl.BlockSpec((1, tb_eff), lambda b: (0, b)),
                pl.BlockSpec((X1_SIZE, tb_eff), lambda b: (0, b)),
            ],
            out_specs=pl.BlockSpec((X2_SIZE, tb_eff), lambda b: (0, b)),
        ),
        compiler_params=pltpu.CompilerParams(
            dimension_semantics=("parallel",)),
    )(x0_t, i0_t, x1_t)

    out = out_t[:, :B].T.reshape(shape + (X2_SIZE,))
    return out


# ----------------------------------------------------------------------------
# Pure-JAX reference (mirrors FallbackImpl semantics) for correctness check.
# ----------------------------------------------------------------------------
def iwstp_reference(x0, i0, x1):
    shape = jnp.broadcast_shapes(i0.shape, x1.shape[:-1])
    B = math.prod(shape)
    i0f = jnp.broadcast_to(i0, shape).reshape(B)
    x1f = jnp.broadcast_to(x1, shape + (X1_SIZE,)).reshape(B, X1_SIZE)
    x0s = x0[i0f].reshape(B, S0, U).astype(jnp.float32)
    x1s = x1f.reshape(B, S1, U).astype(jnp.float32)
    out = jnp.zeros((B, S2, U), jnp.float32)
    for x1_segs, s0, s_out, coeff in PATHS:
        term = coeff * x0s[:, s0, :]
        for sk in x1_segs:
            term = term * x1s[:, sk, :]
        out = out.at[:, s_out, :].add(term)
    return out.astype(x1.dtype).reshape(shape + (X2_SIZE,))


if __name__ == "__main__":
    key = jax.random.PRNGKey(0)
    k0, k1, k2 = jax.random.split(key, 3)

    num_x0 = 5
    batch_shape = (2, 8)     # 16 flattened batch elements

    x0 = jax.random.normal(k0, (num_x0, X0_SIZE), dtype=jnp.float32)
    i0 = jax.random.randint(k1, batch_shape, 0, num_x0, dtype=jnp.int32)
    x1 = jax.random.normal(k2, batch_shape + (X1_SIZE,), dtype=jnp.float32)

    out = iwstp_forward(x0, i0, x1)
    out = jax.block_until_ready(out)

    ref = iwstp_reference(x0, i0, x1)
    assert out.shape == batch_shape + (X2_SIZE,)
    assert jnp.allclose(out, ref, atol=1e-5, rtol=1e-5), "mismatch vs reference"

    print("KERNEL_OK")
</pallas_src>

<mosaic_0001>
module attributes {stable_mosaic.version = 11 : i64} {
  func.func @stp_kernel(%arg0: i32, %arg1: memref<64x5xf32, #tpu.memory_space<vmem>>, %arg2: memref<1x128xi32, #tpu.memory_space<vmem>>, %arg3: memref<96x128xf32, #tpu.memory_space<vmem>>, %arg4: memref<64x128xf32, #tpu.memory_space<vmem>>) attributes {dimension_semantics = [#tpu.dimension_semantics<parallel>], iteration_bounds = array<i64: 1>, scalar_prefetch = 0 : i64, scratch_operands = 0 : i64, tpu.core_type = #tpu.core_type<tc>, window_params = [{pipeline_mode = #tpu.pipeline_mode<synchronous>, transform_indices = @transform_0, window_bounds = array<i64: 64, 5>}, {transform_indices = @transform_1, window_bounds = array<i64: 1, 128>}, {transform_indices = @transform_2, window_bounds = array<i64: 96, 128>}, {transform_indices = @transform_3, window_bounds = array<i64: 64, 128>}]} {
    %c0 = arith.constant 0 : index
    %c0_0 = arith.constant 0 : index
    %0 = vector.load %arg2[%c0, %c0_0] : memref<1x128xi32, #tpu.memory_space<vmem>>, vector<1x128xi32>
    %1 = tpu.iota {dimensions = array<i32: 0>} : vector<5x128xi32>
    %2 = vector.broadcast %0 : vector<1x128xi32> to vector<5x128xi32>
    %3 = arith.cmpi eq, %1, %2 : vector<5x128xi32>
    %4 = arith.extui %3 : vector<5x128xi1> to vector<5x128xi32>
    %5 = arith.sitofp %4 : vector<5x128xi32> to vector<5x128xf32>
    %c0_1 = arith.constant 0 : index
    %c0_2 = arith.constant 0 : index
    %6 = vector.load %arg1[%c0_1, %c0_2] : memref<64x5xf32, #tpu.memory_space<vmem>>, vector<64x5xf32>
    %cst = arith.constant dense<0.000000e+00> : vector<64x128xf32>
    %7 = tpu.matmul %6, %5, %cst {dimension_numbers = #tpu.dot_dimension_numbers<[1], [0], [0], [1], [0, 0, 1, 1], [], []>} : vector<64x5xf32>, vector<5x128xf32>, vector<64x128xf32> -> vector<64x128xf32>
    %c0_3 = arith.constant 0 : index
    %c0_4 = arith.constant 0 : index
    %8 = vector.load %arg3[%c0_3, %c0_4] : memref<96x128xf32, #tpu.memory_space<vmem>>, vector<96x128xf32>
    %9 = vector.extract_strided_slice %7 {offsets = [0, 0], sizes = [32, 128], strides = [1, 1]} : vector<64x128xf32> to vector<32x128xf32>
    %cst_5 = arith.constant 1.000000e+00 : f32
    %10 = vector.broadcast %cst_5 : f32 to vector<32x128xf32>
    %11 = arith.mulf %9, %10 : vector<32x128xf32>
    %12 = vector.extract_strided_slice %8 {offsets = [0, 0], sizes = [32, 128], strides = [1, 1]} : vector<96x128xf32> to vector<32x128xf32>
    %13 = arith.mulf %11, %12 : vector<32x128xf32>
    %14 = vector.extract_strided_slice %7 {offsets = [0, 0], sizes = [32, 128], strides = [1, 1]} : vector<64x128xf32> to vector<32x128xf32>
    %cst_6 = arith.constant 5.000000e-01 : f32
    %15 = vector.broadcast %cst_6 : f32 to vector<32x128xf32>
    %16 = arith.mulf %14, %15 : vector<32x128xf32>
    %17 = vector.extract_strided_slice %8 {offsets = [32, 0], sizes = [32, 128], strides = [1, 1]} : vector<96x128xf32> to vector<32x128xf32>
    %18 = arith.mulf %16, %17 : vector<32x128xf32>
    %19 = vector.extract_strided_slice %7 {offsets = [32, 0], sizes = [32, 128], strides = [1, 1]} : vector<64x128xf32> to vector<32x128xf32>
    %cst_7 = arith.constant -0.699999988 : f32
    %20 = vector.broadcast %cst_7 : f32 to vector<32x128xf32>
    %21 = arith.mulf %19, %20 : vector<32x128xf32>
    %22 = vector.extract_strided_slice %8 {offsets = [64, 0], sizes = [32, 128], strides = [1, 1]} : vector<96x128xf32> to vector<32x128xf32>
    %23 = arith.mulf %21, %22 : vector<32x128xf32>
    %24 = arith.addf %13, %23 : vector<32x128xf32>
    %25 = vector.extract_strided_slice %7 {offsets = [0, 0], sizes = [32, 128], strides = [1, 1]} : vector<64x128xf32> to vector<32x128xf32>
    %cst_8 = arith.constant 3.000000e-01 : f32
    %26 = vector.broadcast %cst_8 : f32 to vector<32x128xf32>
    %27 = arith.mulf %25, %26 : vector<32x128xf32>
    %28 = vector.extract_strided_slice %8 {offsets = [0, 0], sizes = [32, 128], strides = [1, 1]} : vector<96x128xf32> to vector<32x128xf32>
    %29 = arith.mulf %12, %28 : vector<32x128xf32>
    %30 = arith.mulf %27, %29 : vector<32x128xf32>
    %31 = arith.addf %24, %30 : vector<32x128xf32>
    %32 = vector.extract_strided_slice %7 {offsets = [32, 0], sizes = [32, 128], strides = [1, 1]} : vector<64x128xf32> to vector<32x128xf32>
    %cst_9 = arith.constant 1.200000e+00 : f32
    %33 = vector.broadcast %cst_9 : f32 to vector<32x128xf32>
    %34 = arith.mulf %32, %33 : vector<32x128xf32>
    %35 = vector.extract_strided_slice %8 {offsets = [32, 0], sizes = [32, 128], strides = [1, 1]} : vector<96x128xf32> to vector<32x128xf32>
    %36 = arith.mulf %12, %35 : vector<32x128xf32>
    %37 = arith.mulf %34, %36 : vector<32x128xf32>
    %38 = arith.addf %18, %37 : vector<32x128xf32>
    %39 = vector.extract_strided_slice %7 {offsets = [0, 0], sizes = [32, 128], strides = [1, 1]} : vector<64x128xf32> to vector<32x128xf32>
    %cst_10 = arith.constant -4.000000e-01 : f32
    %40 = vector.broadcast %cst_10 : f32 to vector<32x128xf32>
    %41 = arith.mulf %39, %40 : vector<32x128xf32>
    %42 = vector.extract_strided_slice %8 {offsets = [64, 0], sizes = [32, 128], strides = [1, 1]} : vector<96x128xf32> to vector<32x128xf32>
    %43 = arith.mulf %17, %42 : vector<32x128xf32>
    %44 = arith.mulf %41, %43 : vector<32x128xf32>
    %45 = arith.addf %38, %44 : vector<32x128xf32>
    %46 = vector.extract_strided_slice %7 {offsets = [32, 0], sizes = [32, 128], strides = [1, 1]} : vector<64x128xf32> to vector<32x128xf32>
    %cst_11 = arith.constant 8.000000e-01 : f32
    %47 = vector.broadcast %cst_11 : f32 to vector<32x128xf32>
    %48 = arith.mulf %46, %47 : vector<32x128xf32>
    %49 = vector.extract_strided_slice %8 {offsets = [64, 0], sizes = [32, 128], strides = [1, 1]} : vector<96x128xf32> to vector<32x128xf32>
    %50 = arith.mulf %22, %49 : vector<32x128xf32>
    %51 = arith.mulf %48, %50 : vector<32x128xf32>
    %52 = arith.addf %31, %51 : vector<32x128xf32>
    %53 = vector.extract_strided_slice %7 {offsets = [0, 0], sizes = [32, 128], strides = [1, 1]} : vector<64x128xf32> to vector<32x128xf32>
    %cst_12 = arith.constant 2.500000e-01 : f32
    %54 = vector.broadcast %cst_12 : f32 to vector<32x128xf32>
    %55 = arith.mulf %53, %54 : vector<32x128xf32>
    %56 = vector.extract_strided_slice %8 {offsets = [64, 0], sizes = [32, 128], strides = [1, 1]} : vector<96x128xf32> to vector<32x128xf32>
    %57 = arith.mulf %36, %56 : vector<32x128xf32>
    %58 = arith.mulf %55, %57 : vector<32x128xf32>
    %59 = arith.addf %52, %58 : vector<32x128xf32>
    %60 = vector.extract_strided_slice %7 {offsets = [32, 0], sizes = [32, 128], strides = [1, 1]} : vector<64x128xf32> to vector<32x128xf32>
    %cst_13 = arith.constant -1.500000e-01 : f32
    %61 = vector.broadcast %cst_13 : f32 to vector<32x128xf32>
    %62 = arith.mulf %60, %61 : vector<32x128xf32>
    %63 = vector.extract_strided_slice %8 {offsets = [32, 0], sizes = [32, 128], strides = [1, 1]} : vector<96x128xf32> to vector<32x128xf32>
    %64 = arith.mulf %17, %63 : vector<32x128xf32>
    %65 = vector.extract_strided_slice %8 {offsets = [32, 0], sizes = [32, 128], strides = [1, 1]} : vector<96x128xf32> to vector<32x128xf32>
    %66 = arith.mulf %64, %65 : vector<32x128xf32>
    %67 = arith.mulf %62, %66 : vector<32x128xf32>
    %68 = arith.addf %45, %67 : vector<32x128xf32>
    %69 = vector.extract_strided_slice %7 {offsets = [32, 0], sizes = [32, 128], strides = [1, 1]} : vector<64x128xf32> to vector<32x128xf32>
    %cst_14 = arith.constant 6.000000e-01 : f32
    %70 = vector.broadcast %cst_14 : f32 to vector<32x128xf32>
    %71 = arith.mulf %69, %70 : vector<32x128xf32>
    %72 = vector.extract_strided_slice %8 {offsets = [64, 0], sizes = [32, 128], strides = [1, 1]} : vector<96x128xf32> to vector<32x128xf32>
    %73 = arith.mulf %29, %72 : vector<32x128xf32>
    %74 = arith.mulf %71, %73 : vector<32x128xf32>
    %75 = arith.addf %59, %74 : vector<32x128xf32>
    %76 = tpu.concatenate %75, %68 in 0 : vector<32x128xf32>, vector<32x128xf32> -> vector<64x128xf32>
    %c0_15 = arith.constant 0 : index
    %c0_16 = arith.constant 0 : index
    %77 = vector.load %arg4[%c0_15, %c0_16] : memref<64x128xf32, #tpu.memory_space<vmem>>, vector<64x128xf32>
    tpu.vector_store %arg4[%c0_15, %c0_16], %76 {strides = array<i32>} : memref<64x128xf32, #tpu.memory_space<vmem>>, vector<64x128xf32>,
    return
  }
  func.func @transform_0(%arg0: i32) -> (i32, i32) {
    %c0_i32 = arith.constant 0 : i32
    %c0_i32_0 = arith.constant 0 : i32
    %c0_i32_1 = arith.constant 0 : i32
    return %c0_i32, %c0_i32_0 : i32, i32
  }
  func.func @transform_1(%arg0: i32) -> (i32, i32) {
    %c0_i32 = arith.constant 0 : i32
    %c0_i32_0 = arith.constant 0 : i32
    return %c0_i32, %arg0 : i32, i32
  }
  func.func @transform_2(%arg0: i32) -> (i32, i32) {
    %c0_i32 = arith.constant 0 : i32
    %c0_i32_0 = arith.constant 0 : i32
    return %c0_i32, %arg0 : i32, i32
  }
  func.func @transform_3(%arg0: i32) -> (i32, i32) {
    %c0_i32 = arith.constant 0 : i32
    %c0_i32_0 = arith.constant 0 : i32
    return %c0_i32, %arg0 : i32, i32
  }
}

</mosaic_0001>

<bundles_post_ra>
// kernel: tpu_custom_call.1
= control target key start
LH: loop header
LB: loop body
LE: loop exit
PB: predicated region body
PF: predicated region fallthrough
CT: control target
= control target key end

     0   :  { %8 = vsyncpa [#allocation3], 0  ;;  %s644_s0 = inlined_call_operand.vmem [shape: f32[64,5], index: 0, kind: input, shape index: {}]   ;;  %s645_s1 = inlined_call_operand.vmem [shape: s32[1,128], index: 1, kind: input, shape index: {}]   ;;  %s646_s2 = inlined_call_operand.hbm [shape: f32[96,128], index: 2, kind: input, shape index: {}]   ;;  %s647_s3 = inlined_call_operand.hbm [shape: f32[64,128], index: 3, kind: output, shape index: {}]  }
   0x1   :  { %9 = vsyncpa [#allocation4], 0  ;;  %s443_s12 = smov [#allocation2]  }
   0x2   :  { %s19_s13 = sshll.u32 %s443_s12, 4  ;;  %s20_s13 = int_to_ptr.vmem [resolvable:$true] %s19_s13 }
   0x3   :  { %s407_s14 = scalar_lea.vmem %s20_s13, 1536  ;;  %p412_p1 = scmp.lt.s32.totalorder %s20_s13, %s20_s13 }
   0x4   :  { %p408_p0 = scmp.ne.s32.totalorder %s20_s13, %s407_s14  ;;  %p413_p2 = scmp.lt.s32.totalorder %s407_s14, %s407_s14 }
   0x6   :  { %p414_p3 = por %p413_p2, %p412_p1 }
   0x8   :  { %p415_p4 = pnand %p414_p3, %p408_p0 }
   0xa   :  { %418 = shalt.err (!%p415_p4)
}
   0xb   :  { %s444_s15 = smov 128   ;;  %s445_s16 = smov 8  }
   0xc   :  { %25 = dma.hbm_to_vmem [thread:$0]  %s646_s2, 1536, %s20_s13, [#allocation3], %s444_s15, %s444_s15, %s445_s16  }
   0xd   :  { %439 = dma.done.wait [#allocation3], 1536  }
   0xe   :  { %440 = vsyncadd [#allocation3], 4294965760  ;;  %v30_v0 = vlaneseq  ;;  %vm47_vm0 = vcmask 39936   ;;  %v358_v2 = vld [vmem:[%s645_s1] ss:$0 sm:$0xff]  ;;  %vm72_vm1 = vcmask 1044480  }
   0xf   :  { %v39_v3 = vld [vmem:[%s644_s0] sm:$0xff]  ;;  %v446_v5 = vmov 0.0   ;;  %v40_v7 = vld [vmem:[%s644_s0 + $0x8] sm:$0xff]  ;;  %v41_v9 = vld [vmem:[%s644_s0 + $0x10] sm:$0xff] }
  0x10   :  { %v31_v1 = vshrl.u32 %v30_v0, 7  ;;  %v43_v4 = vld [vmem:[%s644_s0 + $0x20] sm:$0xff]  ;;  %380 = vmatprep.mubr.msk.f32.mxu0 %vm47_vm0, %v39_v3  ;;  %v44_v8 = vld [vmem:[%s644_s0 + $0x28] sm:$0xff]  ;;  %v45_v10 = vld [vmem:[%s644_s0 + $0x30] sm:$0xff] }
  0x11   :  { %386 = vmatprep.mubr.msk.f32.mxu1 %vm47_vm0, %v43_v4  ;;  %v42_v11 = vld [vmem:[%s644_s0 + $0x18] sm:$0xff]  ;;  %v186_v13 = vld [vmem:[#allocation2 + $0x28] sm:$0xff]  ;;  %v509_v15 = vld [vmem:[#allocation2] sm:$0xff] }
  0x12   :  { %vm36_vm2 = vcmp.eq.s32.totalorder %v31_v1, %v358_v2  ;;  %v46_v12 = vld [vmem:[%s644_s0 + $0x38] sm:$0xff]  ;;  %v182_v14 = vld [vmem:[#allocation2 + $0x8] sm:$0xff]  ;;  %v511_v16 = vld [vmem:[#allocation2 + $0x20] sm:$0xff]  ;;  %v302_v18 = vmul.f32 %v186_v13, %v186_v13  ;;  %v525_v25 = vmul.f32 %v509_v15, %v509_v15  ;;  %s447_s0 = smov [#allocation5]  }
  0x13   :  { %v359_v6 = vsel %vm36_vm2, 1.0, %v446_v5  ;;  %v238_v17 = vmul.f32 %v186_v13, %v182_v14  ;;  %v513_v19 = vld [vmem:[#allocation2 + $0x18] sm:$0xff]  ;;  %v190_v21 = vld [vmem:[#allocation2 + $0x48] sm:$0xff]  ;;  %v222_v22 = vmul.f32 %v182_v14, %v182_v14  ;;  %v519_v23 = vmul.f32 %v511_v16, %v509_v15  ;;  %v521_v24 = vld [vmem:[#allocation2 + $0x40] sm:$0xff]  ;;  %s346_s8 = sshll.u32 %s447_s0, 4  ;;  %s347_s8 = int_to_ptr.vmem [resolvable:$true] %s346_s8 }
  0x14   :  { %378 = vmatprep.subr.msk.mxu0 %vm72_vm1, %v359_v6  ;;  %392 = vmatprep.subr.msk.mxu1 %vm72_vm1, %v359_v6  ;;  %v515_v20 = vld [vmem:[#allocation2 + $0x38] sm:$0xff]  ;;  %v301_v26 = vmul.f32 %v511_v16, %v511_v16  ;;  %v535_v28 = vmul.f32 %v513_v19, %v513_v19  ;;  %v254_v30 = vmul.f32 %v190_v21, %v186_v13  ;;  %v541_v35 = vld [vmem:[#allocation2 + $0x10] sm:$0xff]  ;;  %s419_s9 = scalar_lea.vmem %s347_s8, 1024  ;;  %p424_p6 = scmp.lt.s32.totalorder %s347_s8, %s347_s8 }
  0x15   :  { %379 = vmatpush3.msk.msra.mxu0 %vm72_vm1, %v359_v6  ;;  %393 = vmatpush3.msk.msra.mxu1 %vm72_vm1, %v359_v6  ;;  %v531_v27 = vmul.f32 %v515_v20, %v513_v19  ;;  %v304_v29 = vmul.f32 %v515_v20, %v515_v20  ;;  %v286_v31 = vmul.f32 %v238_v17, %v190_v21  ;;  %v539_v34 = vld [vmem:[#allocation2 + $0x58] sm:$0xff]  ;;  %v553_v40 = vld [vmem:[#allocation2 + $0x30] sm:$0xff]  ;;  %p420_p5 = scmp.ne.s32.totalorder %s347_s8, %s419_s9  ;;  %p425_p7 = scmp.lt.s32.totalorder %s419_s9, %s419_s9 }
  0x16   :  { %381 = vmatmul.mubr.msk.f32.vlgmr.msra.gmra.mxu0 %vm47_vm0, %v40_v7  ;;  %387 = vmatmul.mubr.msk.f32.vlgmr.msra.gmra.mxu1 %vm47_vm0, %v44_v8  ;;  %v270_v32 = vmul.f32 %v190_v21, %v190_v21  ;;  %v306_v33 = vmul.f32 %v302_v18, %v186_v13  ;;  %v322_v36 = vmul.f32 %v222_v22, %v190_v21  ;;  %v581_v50 = vld [vmem:[#allocation2 + $0x50] sm:$0xff] }
  0x17   :  { %383 = vmatprep.mubr.msk.f32.mxu0 %vm47_vm0, %v41_v9  ;;  %389 = vmatprep.mubr.msk.f32.mxu1 %vm47_vm0, %v45_v10  ;;  %v253_v37 = vmul.f32 %v521_v24, %v511_v16  ;;  %v547_v38 = vmul.f32 %v519_v23, %v521_v24  ;;  %v551_v39 = vmul.f32 %v521_v24, %v521_v24  ;;  %p426_p8 = por %p425_p7, %p424_p6 }
  0x18   :  { %v556_v41 = vmul.f32 %v301_v26, %v511_v16  ;;  %v560_v42 = vmul.f32 %v525_v25, %v521_v24  ;;  %v564_v43 = vmul.f32 %v539_v34, %v515_v20  ;;  %v568_v44 = vmul.f32 %v531_v27, %v539_v34 }
  0x19   :  { %v572_v47 = vmul.f32 %v539_v34, %v539_v34  ;;  %v575_v48 = vmul.f32 %v304_v29, %v515_v20  ;;  %v579_v49 = vmul.f32 %v535_v28, %v539_v34  ;;  %v585_v51 = vmul.f32 %v541_v35, %v541_v35  ;;  %p427_p9 = pnand %p426_p8, %p420_p5 }
  0x1a   :  { %384 = vmatmul.mubr.msk.f32.gmra.mxu0 %vm47_vm0, %v42_v11  ;;  %390 = vmatmul.mubr.msk.f32.gmra.mxu1 %vm47_vm0, %v46_v12  ;;  %v589_v55 = vmul.f32 %v553_v40, %v541_v35  ;;  %v593_v0 = vmul.f32 %v581_v50, %v553_v40  ;;  %v601_v8 = vmul.f32 %v581_v50, %v581_v50 }
  0x1b   :  { %v605_v9 = vmul.f32 %v553_v40, %v553_v40 }
  0x1c   :  { %v597_v7 = vmul.f32 %v589_v55, %v581_v50 }
  0xd6   :  { %v382_v45 = vpop.f32.mrf.mxu0  ;;  %v388_v46 = vpop.f32.mrf.mxu1 }
  0xd7   :  { %v198_v52 = vmul.f32 0.5, %v382_v45  ;;  %v218_v53 = vmul.f32 0.3, %v382_v45  ;;  %v250_v54 = vmul.f32 -0.4, %v382_v45  ;;  %v194_v56 = vmul.f32 %v382_v45, %v182_v14 }
  0xd8   :  { %v282_v57 = vmul.f32 0.25, %v382_v45  ;;  %v206_v58 = vmul.f32 -0.7, %v388_v46  ;;  %v234_v59 = vmul.f32 1.2, %v388_v46  ;;  %v142_v60 = vpop.f32.mrf.mxu0  ;;  %v162_v6 = vpop.f32.mrf.mxu1 }
  0xd9   :  { %v202_v61 = vmul.f32 %v198_v52, %v186_v13  ;;  %v226_v62 = vmul.f32 %v222_v22, %v218_v53  ;;  %v266_v63 = vmul.f32 0.8, %v388_v46  ;;  %v258_v1 = vmul.f32 %v254_v30, %v250_v54 }
  0xda   :  { %v210_v2 = vmul.f32 %v206_v58, %v190_v21  ;;  %v242_v3 = vmul.f32 %v238_v17, %v234_v59  ;;  %v298_v4 = vmul.f32 -0.15, %v388_v46  ;;  %v197_v5 = vmul.f32 0.5, %v142_v60  ;;  %v385_v58 = vpop.f32.mrf.mxu0 }
  0xdb   :  { %v290_v10 = vmul.f32 %v286_v31, %v282_v57  ;;  %v318_v13 = vmul.f32 0.6, %v388_v46  ;;  %v274_v14 = vmul.f32 %v270_v32, %v266_v63  ;;  %v217_v18 = vmul.f32 0.3, %v142_v60  ;;  %v391_v63 = vpop.f32.mrf.mxu1 }
  0xdc   :  { %v214_v11 = vadd.f32 %v210_v2, %v194_v56  ;;  %v246_v12 = vadd.f32 %v242_v3, %v202_v61  ;;  %v310_v17 = vmul.f32 %v306_v33, %v298_v4  ;;  %v249_v21 = vmul.f32 -0.4, %v142_v60 }
  0xdd   :  { %v281_v29 = vmul.f32 0.25, %v142_v60  ;;  %v205_v30 = vmul.f32 -0.7, %v162_v6  ;;  %v193_v45 = vmul.f32 %v509_v15, %v142_v60  ;;  %v201_v52 = vmul.f32 %v197_v5, %v511_v16 }
  0xde   :  { %v230_v22 = vadd.f32 %v226_v62, %v214_v11  ;;  %v262_v26 = vadd.f32 %v258_v1, %v246_v12  ;;  %v233_v53 = vmul.f32 1.2, %v162_v6  ;;  %v265_v54 = vmul.f32 0.8, %v162_v6 }
  0xdf   :  { %v326_v56 = vmul.f32 %v322_v36, %v318_v13  ;;  %v209_v46 = vmul.f32 %v205_v30, %v521_v24  ;;  %v225_v32 = vmul.f32 %v525_v25, %v217_v18  ;;  %v257_v33 = vmul.f32 %v253_v37, %v249_v21 }
  0xe0   :  { %v278_v59 = vadd.f32 %v274_v14, %v230_v22  ;;  %v314_v31 = vadd.f32 %v310_v17, %v262_v26  ;;  %v241_v57 = vmul.f32 %v519_v23, %v233_v53  ;;  %v297_v61 = vmul.f32 -0.15, %v162_v6  ;;  %v152_v17 = vpop.f32.mrf.mxu0 }
  0xe1   :  { %v289_v15 = vmul.f32 %v547_v38, %v281_v29  ;;  %v213_v60 = vadd.f32 %v209_v46, %v193_v45  ;;  %v200_v16 = vmul.f32 0.5, %v385_v58  ;;  %v273_v2 = vmul.f32 %v551_v39, %v265_v54  ;;  %v172_v29 = vpop.f32.mrf.mxu1 }
  0xe2   :  { %v294_v62 = vadd.f32 %v290_v10, %v278_v59  ;;  %338 = vst [vmem:[#allocation5 + $0x28] sm:$0xff] %v314_v31  ;;  %v245_v1 = vadd.f32 %v241_v57, %v201_v52  ;;  %v317_v3 = vmul.f32 0.6, %v162_v6  ;;  %v220_v36 = vmul.f32 0.3, %v385_v58 }
  0xe3   :  { %v229_v24 = vadd.f32 %v225_v32, %v213_v60  ;;  %v196_v25 = vmul.f32 %v385_v58, %v513_v19  ;;  %v252_v37 = vmul.f32 -0.4, %v385_v58  ;;  %v309_v23 = vmul.f32 %v556_v41, %v297_v61 }
  0xe4   :  { %v330_v4 = vadd.f32 %v326_v56, %v294_v62  ;;  %v261_v5 = vadd.f32 %v257_v33, %v245_v1  ;;  %v284_v10 = vmul.f32 0.25, %v385_v58  ;;  %v208_v11 = vmul.f32 -0.7, %v391_v63 }
  0xe5   :  { %v277_v38 = vadd.f32 %v273_v2, %v229_v24  ;;  %v204_v12 = vmul.f32 %v200_v16, %v515_v20  ;;  %v236_v13 = vmul.f32 1.2, %v391_v63  ;;  %v268_v14 = vmul.f32 0.8, %v391_v63 }
  0xe6   :  { %334 = vst [vmem:[#allocation5 + $0x8] sm:$0xff] %v330_v4  ;;  %v313_v39 = vadd.f32 %v309_v23, %v261_v5  ;;  %v228_v6 = vmul.f32 %v535_v28, %v220_v36  ;;  %v212_v18 = vmul.f32 %v208_v11, %v539_v34  ;;  %v300_v21 = vmul.f32 -0.15, %v391_v63 }
  0xe7   :  { %v293_v19 = vadd.f32 %v289_v15, %v277_v38  ;;  %v325_v22 = vmul.f32 %v560_v42, %v317_v3  ;;  %v260_v41 = vmul.f32 %v564_v43, %v252_v37  ;;  %v244_v26 = vmul.f32 %v531_v27, %v236_v13 }
  0xe8   :  { %337 = vst [vmem:[#allocation5 + $0x20] sm:$0xff] %v313_v39  ;;  %v292_v20 = vmul.f32 %v568_v44, %v284_v10  ;;  %v216_v30 = vadd.f32 %v212_v18, %v196_v25  ;;  %v199_v45 = vmul.f32 0.5, %v152_v17  ;;  %v307_v52 = vmul.f32 %v605_v9, %v553_v40 }
  0xe9   :  { %v329_v28 = vadd.f32 %v325_v22, %v293_v19  ;;  %v248_v53 = vadd.f32 %v244_v26, %v204_v12  ;;  %v276_v34 = vmul.f32 %v572_v47, %v268_v14  ;;  %v320_v54 = vmul.f32 0.6, %v391_v63 }
  0xea   :  { %v232_v58 = vadd.f32 %v228_v6, %v216_v30  ;;  %v312_v42 = vmul.f32 %v575_v48, %v300_v21  ;;  %v219_v43 = vmul.f32 0.3, %v152_v17  ;;  %v207_v59 = vmul.f32 -0.7, %v172_v29 }
  0xeb   :  { %333 = vst [vmem:[#allocation5] sm:$0xff] %v329_v28  ;;  %v264_v27 = vadd.f32 %v260_v41, %v248_v53  ;;  %v203_v31 = vmul.f32 %v199_v45, %v553_v40  ;;  %v251_v44 = vmul.f32 -0.4, %v152_v17  ;;  %v235_v56 = vmul.f32 1.2, %v172_v29 }
  0xec   :  { %v280_v46 = vadd.f32 %v276_v34, %v232_v58  ;;  %v195_v32 = vmul.f32 %v541_v35, %v152_v17  ;;  %v211_v9 = vmul.f32 %v207_v59, %v581_v50  ;;  %v267_v33 = vmul.f32 0.8, %v172_v29 }
  0xed   :  { %v316_v57 = vadd.f32 %v312_v42, %v264_v27  ;;  %v328_v47 = vmul.f32 %v579_v49, %v320_v54  ;;  %v243_v61 = vmul.f32 %v589_v55, %v235_v56  ;;  %v299_v48 = vmul.f32 -0.15, %v172_v29 }
  0xee   :  { %v296_v62 = vadd.f32 %v292_v20, %v280_v46  ;;  %v227_v15 = vmul.f32 %v585_v51, %v219_v43  ;;  %v283_v60 = vmul.f32 0.25, %v152_v17  ;;  %v215_v16 = vadd.f32 %v211_v9, %v195_v32 }
  0xef   :  { %340 = vst [vmem:[#allocation5 + $0x38] sm:$0xff] %v316_v57  ;;  %v259_v40 = vmul.f32 %v593_v0, %v251_v44  ;;  %v247_v63 = vadd.f32 %v243_v61, %v203_v31  ;;  %v323_v35 = vmul.f32 %v585_v51, %v581_v50  ;;  %v275_v3 = vmul.f32 %v601_v8, %v267_v33 }
  0xf0   :  { %v332_v1 = vadd.f32 %v328_v47, %v296_v62  ;;  %v231_v2 = vadd.f32 %v227_v15, %v215_v16  ;;  %v319_v49 = vmul.f32 0.6, %v172_v29  ;;  %v311_v55 = vmul.f32 %v307_v52, %v299_v48 }
  0xf1   :  { %v263_v36 = vadd.f32 %v259_v40, %v247_v63  ;;  %v291_v4 = vmul.f32 %v597_v7, %v283_v60 }
  0xf2   :  { %336 = vst [vmem:[#allocation5 + $0x18] sm:$0xff] %v332_v1  ;;  %v279_v24 = vadd.f32 %v275_v3, %v231_v2  ;;  %v327_v0 = vmul.f32 %v323_v35, %v319_v49 }
  0xf3   :  { %v315_v25 = vadd.f32 %v311_v55, %v263_v36 }
  0xf4   :  { %v295_v37 = vadd.f32 %v291_v4, %v279_v24 }
  0xf5   :  { %339 = vst [vmem:[#allocation5 + $0x30] sm:$0xff] %v315_v25 }
  0xf6   :  { %v331_v5 = vadd.f32 %v327_v0, %v295_v37 }
  0xf8   :  { %335 = vst [vmem:[#allocation5 + $0x10] sm:$0xff] %v331_v5 }
  0xf9   :  { %430 = shalt.err (!%p427_p9)
}
  0xfa   :  { %352 = dma.vmem_to_hbm [thread:$0]  %s347_s8, 1024, %s647_s3, [#allocation4], %s444_s15, %s444_s15, %s445_s16  }
  0xfb   :  { %441 = dma.done.wait [#allocation4], 1024  }
  0xfc   :  { %442 = vsyncadd [#allocation4], 4294966272 }
  0xfd   :  { %356 = vsyncpa [#allocation3], 1 }
  0xfe   :  { %357 = vsyncpa [#allocation4], 1 }

</bundles_post_ra>
